<compile_context>
chip_gen: v6e
topology: v6e:2x2x1
jax: 0.10.0
libtpu: 0.0.40
codegen_flags: <defaults>
</compile_context>

<pallas_src>
import jax
import jax.numpy as jnp
from jax.experimental import pallas as pl
from jax.experimental.pallas import tpu as pltpu

_LANE = 128
_SUBLANE = 8
_NEG_INF = -1e30  # pad-lane bias; exp() underflows to exactly 0 in f32


def _round_up(x, m):
    return ((x + m - 1) // m) * m


def actor_kernel(x_ref, w1_ref, b1_ref, w2_ref, b2_ref, w3_ref, b3_ref,
                 logp_ref, lse_ref):
    # In-kernel bf16 cast of the f32 input tile (free under the DMA shadow).
    x = x_ref[...].astype(jnp.bfloat16)

    # fc_1 + ReLU  (bf16 MXU inputs, f32 accumulate)
    h1 = jnp.dot(x, w1_ref[...], preferred_element_type=jnp.float32)
    h1 = jnp.maximum(h1 + b1_ref[...], 0.0)

    # fc_2 + ReLU
    h2 = jnp.dot(h1.astype(jnp.bfloat16), w2_ref[...],
                 preferred_element_type=jnp.float32)
    h2 = jnp.maximum(h2 + b2_ref[...], 0.0)

    # pi_logits (lane-padded head: pad columns are zero-weight, bias -1e30).
    logits = jnp.dot(h2.astype(jnp.bfloat16), w3_ref[...],
                     preferred_element_type=jnp.float32) + b3_ref[...]

    # Categorical(logits=...) normalization.  Pad lanes sit at ~-1e30 so they
    # contribute exactly 0 to the sum -> logsumexp over the padded width is
    # exact.  Only the real action lanes + the per-row lse are written to HBM.
    m = jnp.max(logits, axis=-1, keepdims=True)
    z = logits - m
    lse = m + jnp.log(jnp.sum(jnp.exp(z), axis=-1, keepdims=True))
    logp_ref[...] = (logits - lse)[:, :logp_ref.shape[-1]]
    lse_ref[...] = lse


def prepare_actor_params(params):
    """One-time weight preparation (hoisted out of the per-step forward).

    Casts weights to bf16 for the MXU fast path and builds the lane-dense
    padded action head (zero-weight pad columns, -1e30 pad-lane bias).
    """
    hid2 = params["w2"].shape[1]
    actions_dim = params["w3"].shape[1]
    a_pad = _round_up(max(actions_dim, _LANE), _LANE)

    w3p = jnp.zeros((hid2, a_pad), jnp.bfloat16)
    w3p = w3p.at[:, :actions_dim].set(params["w3"].astype(jnp.bfloat16))
    b3p = jnp.full((1, a_pad), _NEG_INF, jnp.float32)
    b3p = b3p.at[:, :actions_dim].set(params["b3"].astype(jnp.float32))

    return {
        "w1": params["w1"].astype(jnp.bfloat16),
        "b1": params["b1"].astype(jnp.float32),
        "w2": params["w2"].astype(jnp.bfloat16),
        "b2": params["b2"].astype(jnp.float32),
        "w3p": w3p,
        "b3p": b3p,
    }


def actor_forward(x, prepared, *, actions_dim, block_batch=2048):
    """Fused Actor MLP.

    Args:
      x: [batch, input_dim] float32.
      prepared: output of prepare_actor_params().
      actions_dim: static number of actions (padded head is wider).
      block_batch: cap on the batch tile (multiple of 8).
    Returns:
      (logits, log_probs), both [batch, actions_dim] float32.
    """
    batch, input_dim = x.shape
    hid1 = prepared["w1"].shape[1]
    hid2 = prepared["w2"].shape[1]
    a_pad = prepared["w3p"].shape[1]

    # Batch tiling: multiples of the 8-sublane granule; aim for >=4 grid steps
    # when the batch allows (>=2 per TensorCore on v7x megacore, and keeps the
    # input/output double-buffer overlap alive), capped at block_batch.
    batch_r = _round_up(batch, _SUBLANE)
    tb = min(block_batch,
             max(_SUBLANE, _round_up(pl.cdiv(batch_r, 4), _SUBLANE)))
    batch_p = _round_up(batch_r, tb)
    xp = x.astype(jnp.float32)
    if batch_p != batch:
        xp = jnp.pad(xp, ((0, batch_p - batch), (0, 0)))
    grid = (batch_p // tb,)

    def pinned(shape):
        return pl.BlockSpec(shape, lambda i: (0,) * len(shape))

    # Advisory cost model reflecting the narrowed outputs.
    flops = 2 * batch_p * (input_dim * hid1 + hid1 * hid2 + hid2 * a_pad)
    bytes_accessed = (
        batch_p * input_dim * 4                                        # f32 x in
        + (prepared["w1"].size + prepared["w2"].size
           + prepared["w3p"].size) * 2                                 # bf16 weights
        + (prepared["b1"].size + prepared["b2"].size
           + prepared["b3p"].size) * 4                                 # f32 biases
        + batch_p * (actions_dim + 1) * 4)                             # narrow outputs
    cost = pl.CostEstimate(flops=flops,
                           transcendentals=batch_p * (a_pad + 1),
                           bytes_accessed=bytes_accessed)

    logp_p, lse_p = pl.pallas_call(
        actor_kernel,
        out_shape=(
            jax.ShapeDtypeStruct((batch_p, actions_dim), jnp.float32),
            jax.ShapeDtypeStruct((batch_p, 1), jnp.float32),
        ),
        grid=grid,
        in_specs=[
            pl.BlockSpec((tb, input_dim), lambda i: (i, 0)),  # x: batch-tiled
            pinned(prepared["w1"].shape),                     # weights stay VMEM-resident
            pinned(prepared["b1"].shape),
            pinned(prepared["w2"].shape),
            pinned(prepared["b2"].shape),
            pinned(prepared["w3p"].shape),
            pinned(prepared["b3p"].shape),
        ],
        out_specs=(
            pl.BlockSpec((tb, actions_dim), lambda i: (i, 0)),
            pl.BlockSpec((tb, 1), lambda i: (i, 0)),
        ),
        compiler_params=pltpu.CompilerParams(
            dimension_semantics=("parallel",)),               # v7x megacore sharding
        cost_estimate=cost,
    )(xp, prepared["w1"], prepared["b1"], prepared["w2"], prepared["b2"],
      prepared["w3p"], prepared["b3p"])

    log_probs = logp_p[:batch]
    # logits = log_probs + logsumexp(logits); exact to f32 rounding.
    logits = log_probs + lse_p[:batch]
    return logits, log_probs


def init_params(key, input_dim, actions_dim):
    """Deterministic, PyTorch-Linear-style uniform init."""
    ks = jax.random.split(key, 6)

    def lin(kw, kb, fan_in, fan_out):
        bound = 1.0 / jnp.sqrt(fan_in)
        w = jax.random.uniform(kw, (fan_in, fan_out), jnp.float32, -bound, bound)
        b = jax.random.uniform(kb, (1, fan_out), jnp.float32, -bound, bound)
        return w, b

    w1, b1 = lin(ks[0], ks[1], input_dim, 128)
    w2, b2 = lin(ks[2], ks[3], 128, 256)
    w3, b3 = lin(ks[4], ks[5], 256, actions_dim)
    return {"w1": w1, "b1": b1, "w2": w2, "b2": b2, "w3": w3, "b3": b3}


def actor_reference(x, p):
    """Pure-JAX reference using the same bf16-in / f32-accumulate recipe."""
    h1 = jnp.dot(x.astype(jnp.bfloat16), p["w1"].astype(jnp.bfloat16),
                 preferred_element_type=jnp.float32) + p["b1"]
    h1 = jnp.maximum(h1, 0.0)
    h2 = jnp.dot(h1.astype(jnp.bfloat16), p["w2"].astype(jnp.bfloat16),
                 preferred_element_type=jnp.float32) + p["b2"]
    h2 = jnp.maximum(h2, 0.0)
    logits = jnp.dot(h2.astype(jnp.bfloat16), p["w3"].astype(jnp.bfloat16),
                     preferred_element_type=jnp.float32) + p["b3"]
    logp = jax.nn.log_softmax(logits, axis=-1)
    return logits, logp


if __name__ == "__main__":
    key = jax.random.PRNGKey(0)
    k_param, k_x = jax.random.split(key)

    batch, input_dim, actions_dim = 8, 32, 8
    params = init_params(k_param, input_dim, actions_dim)
    x = jax.random.normal(k_x, (batch, input_dim), jnp.float32)

    # Weight prep (casts + head padding) is done once, outside the hot path.
    prepared = prepare_actor_params(params)

    fwd = jax.jit(actor_forward, static_argnames=("actions_dim", "block_batch"))
    logits, log_probs = fwd(x, prepared, actions_dim=actions_dim)
    jax.block_until_ready((logits, log_probs))

    ref_logits, ref_logp = actor_reference(x, params)
    assert logits.shape == (batch, actions_dim)
    assert log_probs.shape == (batch, actions_dim)
    assert jnp.allclose(logits, ref_logits, atol=2e-3, rtol=2e-3)
    assert jnp.allclose(log_probs, ref_logp, atol=2e-3, rtol=2e-3)
    # probs must sum to 1 (Categorical is fully determined by log_probs).
    assert jnp.allclose(jnp.sum(jnp.exp(log_probs), axis=-1), 1.0, atol=1e-4)
    # TODO(synk): Categorical sampling/entropy are host-side distribution ops,
    # not part of the kernel; log_probs/logits fully determine the distribution.
    print("KERNEL_OK")
</pallas_src>

<mosaic_0001>
module attributes {stable_mosaic.version = 11 : i64} {
  func.func @actor_kernel(%arg0: i32, %arg1: memref<8x32xf32, #tpu.memory_space<vmem>>, %arg2: memref<32x128xbf16, #tpu.memory_space<vmem>>, %arg3: memref<1x128xf32, #tpu.memory_space<vmem>>, %arg4: memref<128x256xbf16, #tpu.memory_space<vmem>>, %arg5: memref<1x256xf32, #tpu.memory_space<vmem>>, %arg6: memref<256x128xbf16, #tpu.memory_space<vmem>>, %arg7: memref<1x128xf32, #tpu.memory_space<vmem>>, %arg8: memref<8x8xf32, #tpu.memory_space<vmem>>, %arg9: memref<8x1xf32, #tpu.memory_space<vmem>>) attributes {dimension_semantics = [#tpu.dimension_semantics<parallel>], iteration_bounds = array<i64: 1>, scalar_prefetch = 0 : i64, scratch_operands = 0 : i64, tpu.core_type = #tpu.core_type<tc>, window_params = [{transform_indices = @transform_0, window_bounds = array<i64: 8, 32>}, {pipeline_mode = #tpu.pipeline_mode<synchronous>, transform_indices = @transform_1, window_bounds = array<i64: 32, 128>}, {pipeline_mode = #tpu.pipeline_mode<synchronous>, transform_indices = @transform_2, window_bounds = array<i64: 1, 128>}, {pipeline_mode = #tpu.pipeline_mode<synchronous>, transform_indices = @transform_3, window_bounds = array<i64: 128, 256>}, {pipeline_mode = #tpu.pipeline_mode<synchronous>, transform_indices = @transform_4, window_bounds = array<i64: 1, 256>}, {pipeline_mode = #tpu.pipeline_mode<synchronous>, transform_indices = @transform_5, window_bounds = array<i64: 256, 128>}, {pipeline_mode = #tpu.pipeline_mode<synchronous>, transform_indices = @transform_6, window_bounds = array<i64: 1, 128>}, {transform_indices = @transform_7, window_bounds = array<i64: 8, 8>}, {transform_indices = @transform_8, window_bounds = array<i64: 8, 1>}]} {
    %c0 = arith.constant 0 : index
    %c0_0 = arith.constant 0 : index
    %0 = vector.load %arg1[%c0, %c0_0] : memref<8x32xf32, #tpu.memory_space<vmem>>, vector<8x32xf32>
    %1 = arith.truncf %0 : vector<8x32xf32> to vector<8x32xbf16>
    %c0_1 = arith.constant 0 : index
    %c0_2 = arith.constant 0 : index
    %2 = vector.load %arg2[%c0_1, %c0_2] : memref<32x128xbf16, #tpu.memory_space<vmem>>, vector<32x128xbf16>
    %cst = arith.constant dense<0.000000e+00> : vector<8x128xf32>
    %3 = tpu.matmul %1, %2, %cst {dimension_numbers = #tpu.dot_dimension_numbers<[1], [0], [0], [1], [0, 0, 1, 1], [], []>} : vector<8x32xbf16>, vector<32x128xbf16>, vector<8x128xf32> -> vector<8x128xf32>
    %c0_3 = arith.constant 0 : index
    %c0_4 = arith.constant 0 : index
    %4 = vector.load %arg3[%c0_3, %c0_4] : memref<1x128xf32, #tpu.memory_space<vmem>>, vector<1x128xf32>
    %5 = vector.broadcast %4 : vector<1x128xf32> to vector<8x128xf32>
    %6 = arith.addf %3, %5 : vector<8x128xf32>
    %cst_5 = arith.constant 0.000000e+00 : f32
    %7 = vector.broadcast %cst_5 : f32 to vector<8x128xf32>
    %8 = arith.maximumf %6, %7 : vector<8x128xf32>
    %9 = arith.truncf %8 : vector<8x128xf32> to vector<8x128xbf16>
    %c0_6 = arith.constant 0 : index
    %c0_7 = arith.constant 0 : index
    %10 = vector.load %arg4[%c0_6, %c0_7] : memref<128x256xbf16, #tpu.memory_space<vmem>>, vector<128x256xbf16>
    %cst_8 = arith.constant dense<0.000000e+00> : vector<8x256xf32>
    %11 = tpu.matmul %9, %10, %cst_8 {dimension_numbers = #tpu.dot_dimension_numbers<[1], [0], [0], [1], [0, 0, 1, 1], [], []>} : vector<8x128xbf16>, vector<128x256xbf16>, vector<8x256xf32> -> vector<8x256xf32>
    %c0_9 = arith.constant 0 : index
    %c0_10 = arith.constant 0 : index
    %12 = vector.load %arg5[%c0_9, %c0_10] : memref<1x256xf32, #tpu.memory_space<vmem>>, vector<1x256xf32>
    %13 = vector.broadcast %12 : vector<1x256xf32> to vector<8x256xf32>
    %14 = arith.addf %11, %13 : vector<8x256xf32>
    %cst_11 = arith.constant 0.000000e+00 : f32
    %15 = vector.broadcast %cst_11 : f32 to vector<8x256xf32>
    %16 = arith.maximumf %14, %15 : vector<8x256xf32>
    %17 = arith.truncf %16 : vector<8x256xf32> to vector<8x256xbf16>
    %c0_12 = arith.constant 0 : index
    %c0_13 = arith.constant 0 : index
    %18 = vector.load %arg6[%c0_12, %c0_13] : memref<256x128xbf16, #tpu.memory_space<vmem>>, vector<256x128xbf16>
    %cst_14 = arith.constant dense<0.000000e+00> : vector<8x128xf32>
    %19 = tpu.matmul %17, %18, %cst_14 {dimension_numbers = #tpu.dot_dimension_numbers<[1], [0], [0], [1], [0, 0, 1, 1], [], []>} : vector<8x256xbf16>, vector<256x128xbf16>, vector<8x128xf32> -> vector<8x128xf32>
    %c0_15 = arith.constant 0 : index
    %c0_16 = arith.constant 0 : index
    %20 = vector.load %arg7[%c0_15, %c0_16] : memref<1x128xf32, #tpu.memory_space<vmem>>, vector<1x128xf32>
    %21 = vector.broadcast %20 : vector<1x128xf32> to vector<8x128xf32>
    %22 = arith.addf %19, %21 : vector<8x128xf32>
    %cst_17 = arith.constant dense<0xFF800000> : vector<8xf32>
    %23 = vector.multi_reduction <maximumf>, %22, %cst_17 [1] : vector<8x128xf32> to vector<8xf32>
    %24 = vector.shape_cast %23 : vector<8xf32> to vector<8x1xf32>
    %25 = vector.broadcast %24 : vector<8x1xf32> to vector<8x128xf32>
    %26 = arith.subf %22, %25 : vector<8x128xf32>
    %27 = math.exp %26 : vector<8x128xf32>
    %cst_18 = arith.constant dense<0.000000e+00> : vector<8xf32>
    %28 = vector.multi_reduction <add>, %27, %cst_18 [1] : vector<8x128xf32> to vector<8xf32>
    %29 = vector.shape_cast %28 : vector<8xf32> to vector<8x1xf32>
    %30 = math.log %29 : vector<8x1xf32>
    %31 = arith.addf %24, %30 : vector<8x1xf32>
    %32 = vector.broadcast %31 : vector<8x1xf32> to vector<8x128xf32>
    %33 = arith.subf %22, %32 : vector<8x128xf32>
    %34 = vector.extract_strided_slice %33 {offsets = [0, 0], sizes = [8, 8], strides = [1, 1]} : vector<8x128xf32> to vector<8x8xf32>
    %c0_19 = arith.constant 0 : index
    %c0_20 = arith.constant 0 : index
    %35 = vector.load %arg8[%c0_19, %c0_20] : memref<8x8xf32, #tpu.memory_space<vmem>>, vector<8x8xf32>
    tpu.vector_store %arg8[%c0_19, %c0_20], %34 {strides = array<i32>} : memref<8x8xf32, #tpu.memory_space<vmem>>, vector<8x8xf32>,
    %c0_21 = arith.constant 0 : index
    %c0_22 = arith.constant 0 : index
    %36 = vector.load %arg9[%c0_21, %c0_22] : memref<8x1xf32, #tpu.memory_space<vmem>>, vector<8x1xf32>
    tpu.vector_store %arg9[%c0_21, %c0_22], %31 {strides = array<i32>} : memref<8x1xf32, #tpu.memory_space<vmem>>, vector<8x1xf32>,
    return
  }
  func.func @transform_0(%arg0: i32) -> (i32, i32) {
    %c0_i32 = arith.constant 0 : i32
    %c0_i32_0 = arith.constant 0 : i32
    return %arg0, %c0_i32 : i32, i32
  }
  func.func @transform_1(%arg0: i32) -> (i32, i32) {
    %c0_i32 = arith.constant 0 : i32
    %c0_i32_0 = arith.constant 0 : i32
    %c0_i32_1 = arith.constant 0 : i32
    return %c0_i32, %c0_i32_0 : i32, i32
  }
  func.func @transform_2(%arg0: i32) -> (i32, i32) {
    %c0_i32 = arith.constant 0 : i32
    %c0_i32_0 = arith.constant 0 : i32
    %c0_i32_1 = arith.constant 0 : i32
    return %c0_i32, %c0_i32_0 : i32, i32
  }
  func.func @transform_3(%arg0: i32) -> (i32, i32) {
    %c0_i32 = arith.constant 0 : i32
    %c0_i32_0 = arith.constant 0 : i32
    %c0_i32_1 = arith.constant 0 : i32
    return %c0_i32, %c0_i32_0 : i32, i32
  }
  func.func @transform_4(%arg0: i32) -> (i32, i32) {
    %c0_i32 = arith.constant 0 : i32
    %c0_i32_0 = arith.constant 0 : i32
    %c0_i32_1 = arith.constant 0 : i32
    return %c0_i32, %c0_i32_0 : i32, i32
  }
  func.func @transform_5(%arg0: i32) -> (i32, i32) {
    %c0_i32 = arith.constant 0 : i32
    %c0_i32_0 = arith.constant 0 : i32
    %c0_i32_1 = arith.constant 0 : i32
    return %c0_i32, %c0_i32_0 : i32, i32
  }
  func.func @transform_6(%arg0: i32) -> (i32, i32) {
    %c0_i32 = arith.constant 0 : i32
    %c0_i32_0 = arith.constant 0 : i32
    %c0_i32_1 = arith.constant 0 : i32
    return %c0_i32, %c0_i32_0 : i32, i32
  }
  func.func @transform_7(%arg0: i32) -> (i32, i32) {
    %c0_i32 = arith.constant 0 : i32
    %c0_i32_0 = arith.constant 0 : i32
    return %arg0, %c0_i32 : i32, i32
  }
  func.func @transform_8(%arg0: i32) -> (i32, i32) {
    %c0_i32 = arith.constant 0 : i32
    %c0_i32_0 = arith.constant 0 : i32
    return %arg0, %c0_i32 : i32, i32
  }
}

</mosaic_0001>

<bundles_post_ra>
// kernel: actor_forward.1
= control target key start
LH: loop header
LB: loop body
LE: loop exit
PB: predicated region body
PF: predicated region fallthrough
CT: control target
= control target key end

     0   :  { %14 = vsyncpa [#allocation3], 0  ;;  %s809_s0 = inlined_call_operand.hbm [shape: f32[8,32], index: 0, kind: input, shape index: {}]   ;;  %s810_s1 = inlined_call_operand.hbm [shape: bf16[32,128], index: 1, kind: input, shape index: {}]   ;;  %s811_s2 = inlined_call_operand.vmem [shape: f32[1,128], index: 2, kind: input, shape index: {}]   ;;  %s812_s3 = inlined_call_operand.hbm [shape: bf16[128,256], index: 3, kind: input, shape index: {}]   ;;  %s813_s4 = inlined_call_operand.vmem [shape: f32[1,256], index: 4, kind: input, shape index: {}]   ;;  %s814_s5 = inlined_call_operand.hbm [shape: bf16[256,128], index: 5, kind: input, shape index: {}]   ;;  %s815_s6 = inlined_call_operand.vmem [shape: f32[1,128], index: 6, kind: input, shape index: {}]   ;;  %s816_s7 = inlined_call_operand.vmem [shape: f32[8,8], index: 7, kind: output, shape index: {0}]   ;;  %s817_s8 = inlined_call_operand.vmem [shape: f32[8,1], index: 8, kind: output, shape index: {1}]  }
   0x1   :  { %15 = vsyncpa [#allocation5], 0 }
   0x2   :  { %16 = vsyncpa [#allocation8], 0  ;;  %s720_s27 = smov [#allocation4]  }
   0x3   :  { %s32_s28 = sshll.u32 %s720_s27, 4  ;;  %s33_s28 = int_to_ptr.vmem [resolvable:$true] %s32_s28 }
   0x4   :  { %s642_s29 = scalar_lea.vmem %s33_s28, 256  ;;  %p647_p1 = scmp.lt.s32.totalorder %s33_s28, %s33_s28 }
   0x5   :  { %p643_p0 = scmp.ne.s32.totalorder %s33_s28, %s642_s29  ;;  %p648_p2 = scmp.lt.s32.totalorder %s642_s29, %s642_s29 }
   0x7   :  { %p649_p3 = por %p648_p2, %p647_p1 }
   0x9   :  { %p650_p4 = pnand %p649_p3, %p643_p0 }
   0xb   :  { %653 = shalt.err (!%p650_p4)
}
   0xc   :  { %s721_s30 = smov 64   ;;  %s722_s9 = smov 4  }
   0xd   :  { %38 = dma.hbm_to_vmem [thread:$0]  %s810_s1, 256, %s33_s28, [#allocation5], %s721_s30, %s721_s30, %s722_s9  }
   0xe   :  { %s723_s12 = smov [#allocation2]   ;;  %s724_s14 = smov [#allocation6]  }
   0xf   :  { %s23_s13 = sshll.u32 %s723_s12, 4  ;;  %s46_s15 = sshll.u32 %s724_s14, 4  ;;  %s24_s13 = int_to_ptr.vmem [resolvable:$true] %s23_s13  ;;  %s47_s15 = int_to_ptr.vmem [resolvable:$true] %s46_s15 }
  0x10   :  { %s662_s16 = scalar_lea.vmem %s24_s13, 128  ;;  %p667_p6 = scmp.lt.s32.totalorder %s24_s13, %s24_s13 }
  0x11   :  { %p663_p5 = scmp.ne.s32.totalorder %s24_s13, %s662_s16  ;;  %p668_p7 = scmp.lt.s32.totalorder %s662_s16, %s662_s16 }
  0x13   :  { %p669_p8 = por %p668_p7, %p667_p6 }
  0x15   :  { %p670_p9 = pnand %p669_p8, %p663_p5 }
  0x17   :  { %673 = shalt.err (!%p670_p9)
}
  0x18   :  { %26 = dma.hbm_to_vmem [thread:$0]  %s809_s0, 128, %s24_s13, [#allocation3]  }
  0x19   :  { %s682_s19 = scalar_lea.vmem %s47_s15, 2048  ;;  %p687_p11 = scmp.lt.s32.totalorder %s47_s15, %s47_s15 }
  0x1a   :  { %p683_p10 = scmp.ne.s32.totalorder %s47_s15, %s682_s19  ;;  %p688_p12 = scmp.lt.s32.totalorder %s682_s19, %s682_s19 }
  0x1c   :  { %p689_p13 = por %p688_p12, %p687_p11 }
  0x1e   :  { %p690_p0 = pnand %p689_p13, %p683_p10 }
  0x20   :  { %693 = shalt.err (!%p690_p0)
}
  0x21   :  { %s725_s1 = smov 128   ;;  %s726_s20 = smov 8  }
  0x22   :  { %52 = dma.hbm_to_vmem [thread:$0]  %s812_s3, 2048, %s47_s15, [#allocation5], %s725_s1, %s725_s1, %s726_s20  }
  0x23   :  { %s727_s23 = smov [#allocation7]  }
  0x24   :  { %s60_s24 = sshll.u32 %s727_s23, 4  ;;  %s61_s24 = int_to_ptr.vmem [resolvable:$true] %s60_s24 }
  0x25   :  { %s702_s25 = scalar_lea.vmem %s61_s24, 2048  ;;  %p707_p2 = scmp.lt.s32.totalorder %s61_s24, %s61_s24 }
  0x26   :  { %p703_p1 = scmp.ne.s32.totalorder %s61_s24, %s702_s25  ;;  %p708_p3 = scmp.lt.s32.totalorder %s702_s25, %s702_s25 }
  0x28   :  { %p709_p4 = por %p708_p3, %p707_p2 }
  0x2a   :  { %p710_p5 = pnand %p709_p4, %p703_p1 }
  0x2c   :  { %713 = shalt.err (!%p710_p5)
}
  0x2d   :  { %66 = dma.hbm_to_vmem [thread:$0]  %s814_s5, 2048, %s61_s24, [#allocation8], %s721_s30, %s721_s30, %s722_s9  }
  0x2e   :  { %714 = dma.done.wait [#allocation3], 128  }
  0x2f   :  { %715 = vsyncadd [#allocation3], 4294967168 }
  0x30   :  { %716 = dma.done.wait [#allocation5], 2304  }
  0x31   :  { %717 = vsyncadd [#allocation5], 4294964992 }
  0x32   :  { %718 = dma.done.wait [#allocation8], 2048  }
  0x33   :  { %719 = vsyncadd [#allocation8], 4294965248  ;;  %v728_v0 = vmov 0.0   ;;  %vm729_vm0 = vmmov 0   ;;  %v588_v1 = vld [vmem:[#allocation4 + $0x8] sm:$0xff]   ;;  %v589_v2 = vld [vmem:[#allocation4] sm:$0xff]   ;;  %v171_v46 = vlaneseq }
  0x34   :  { %569 = vmatprep.subr.bf16.mxu0 %v728_v0  ;;  %573 = vmatprep.mubr.msk.bf16.mxu0 %vm729_vm0, %v728_v0  ;;  %v82_v3 = vld [vmem:[#allocation2] sm:$0xff]  ;;  %v590_v4 = vld [vmem:[#allocation6 + $0x74] ss:$8 sps:$4 sm:$0xff]   ;;  %v592_v5 = vld [vmem:[#allocation6 + $0x70] ss:$8 sps:$4 sm:$0xff]   ;;  %vm107_vm1 = vcmask 261120  }
  0x35   :  { %570 = vmatpush3.bf16.msra.mxu0 %v588_v1  ;;  %v593_v6 = vld [vmem:[#allocation6 + $0x64] ss:$8 sps:$4 sm:$0xff]   ;;  %v83_v7 = vpack.c.bf16 %v82_v3, %v82_v3  ;;  %261 = vmatprep.subr.bf16.mxu1 %v590_v4  ;;  %v595_v8 = vld [vmem:[#allocation6 + $0x60] ss:$8 sps:$4 sm:$0xff]   ;;  %v596_v9 = vld [vmem:[#allocation6 + $0x54] ss:$8 sps:$4 sm:$0xff]  }
  0x36   :  { %571 = vmatprep.subr.bf16.mxu0 %v728_v0  ;;  %262 = vmatpush1.bf16.msra.mxu1 %v592_v5  ;;  %v598_v10 = vld [vmem:[#allocation6 + $0x50] ss:$8 sps:$4 sm:$0xff]   ;;  %v599_v11 = vld [vmem:[#allocation6 + $0x44] ss:$8 sps:$4 sm:$0xff]   ;;  %v601_v12 = vld [vmem:[#allocation6 + $0x40] ss:$8 sps:$4 sm:$0xff]  }
  0x37   :  { %263 = vmatprep.subr.bf16.mxu1 %v593_v6  ;;  %v602_v13 = vld [vmem:[#allocation6 + $0x34] ss:$8 sps:$4 sm:$0xff]   ;;  %v604_v14 = vld [vmem:[#allocation6 + $0x30] ss:$8 sps:$4 sm:$0xff]   ;;  %v605_v15 = vld [vmem:[#allocation6 + $0x24] ss:$8 sps:$4 sm:$0xff]  }
  0x38   :  { %v607_v16 = vld [vmem:[#allocation6 + $0x20] ss:$8 sps:$4 sm:$0xff]   ;;  %v608_v17 = vld [vmem:[#allocation6 + $0x14] ss:$8 sps:$4 sm:$0xff]   ;;  %v610_v18 = vld [vmem:[#allocation6 + $0x10] ss:$8 sps:$4 sm:$0xff]  }
  0x39   :  { %572 = vmatpush3.bf16.msra.mxu0 %v589_v2  ;;  %v611_v19 = vld [vmem:[#allocation6 + $0x4] ss:$8 sps:$4 sm:$0xff]   ;;  %v613_v20 = vld [vmem:[#allocation6] ss:$8 sps:$4 sm:$0xff]   ;;  %v730_v21 = vmov 0   ;;  %v614_v22 = vld [vmem:[#allocation7 + $0x78] sm:$0xff]  }
  0x3a   :  { %264 = vmatpush1.bf16.msra.mxu1 %v595_v8  ;;  %293 = vmatprep.mubr.bf16.mxu1 %v730_v21  ;;  %v615_v23 = vld [vmem:[#allocation7 + $0x38] sm:$0xff]   ;;  %v616_v24 = vld [vmem:[#allocation7 + $0x70] sm:$0xff]   ;;  %v618_v26 = vld [vmem:[#allocation7 + $0x68] sm:$0xff]   ;;  %v172_v47 = vshrl.u32 %v171_v46, 7  ;;  %vm494_vm2 = vcmask 7168   ;;  %vm492_vm3 = vcmask 64512  }
  0x3b   :  { %265 = vmatprep.subr.bf16.mxu1 %v596_v9  ;;  %547 = vmatprep.subr.bf16.mxu0 %v614_v22  ;;  %v617_v25 = vld [vmem:[#allocation7 + $0x30] sm:$0xff]   ;;  %v619_v27 = vld [vmem:[#allocation7 + $0x28] sm:$0xff]   ;;  %v620_v28 = vld [vmem:[#allocation7 + $0x60] sm:$0xff]  }
  0x3c   :  { %574 = vmatmul.mubr.msk.bf16.vlgmr.msra.gmra.mxu0 %vm107_vm1, %v83_v7  ;;  %v621_v29 = vld [vmem:[#allocation7 + $0x20] sm:$0xff]   ;;  %v622_v30 = vld [vmem:[#allocation7 + $0x58] sm:$0xff]   ;;  %v624_v32 = vld [vmem:[#allocation7 + $0x50] sm:$0xff]   ;;  %v173_v48 = vsub.s32 0, %v172_v47  ;;  %v177_v50 = vsub.s32 1, %v172_v47 }
  0x3d   :  { %548 = vmatpush3.bf16.msra.mxu0 %v615_v23  ;;  %v623_v31 = vld [vmem:[#allocation7 + $0x18] sm:$0xff]   ;;  %v625_v33 = vld [vmem:[#allocation7 + $0x10] sm:$0xff]   ;;  %v507_v34 = vld [vmem:[%s811_s2] ss:$0 sm:$0xff] }
  0x3e   :  { %266 = vmatpush1.bf16.msra.mxu1 %v598_v10  ;;  %549 = vmatprep.subr.bf16.mxu0 %v616_v24  ;;  %v626_v42 = vld [vmem:[#allocation7 + $0x48] sm:$0xff]   ;;  %v628_v44 = vld [vmem:[#allocation7 + $0x40] sm:$0xff]  }
  0x3f   :  { %267 = vmatprep.subr.bf16.mxu1 %v599_v11  ;;  %v627_v43 = vld [vmem:[#allocation7 + $0x8] sm:$0xff]   ;;  %v629_v45 = vld [vmem:[#allocation7] sm:$0xff]  }
  0x40   :  { %v169_v49 = vld [vmem:[%s813_s4] sm:$0x3] }
  0x41   :  { %550 = vmatpush3.bf16.msra.mxu0 %v617_v25  ;;  %v174_v51 = vrot.slane %v169_v49, %v173_v48  ;;  %v178_v52 = vrot.slane %v169_v49, %v177_v50  ;;  %v527_v0 = vld [vmem:[%s815_s6] ss:$0 sm:$0xff] }
  0x42   :  { %268 = vmatpush1.bf16.msra.mxu1 %v601_v12  ;;  %551 = vmatprep.subr.bf16.mxu0 %v618_v26 }
  0x43   :  { %269 = vmatprep.subr.bf16.mxu1 %v602_v13 }
  0x45   :  { %552 = vmatpush3.bf16.msra.mxu0 %v619_v27 }
  0x46   :  { %270 = vmatpush1.bf16.msra.mxu1 %v604_v14  ;;  %553 = vmatprep.subr.bf16.mxu0 %v620_v28 }
  0x47   :  { %271 = vmatprep.subr.bf16.mxu1 %v605_v15 }
  0x49   :  { %554 = vmatpush3.bf16.msra.mxu0 %v621_v29 }
  0x4a   :  { %272 = vmatpush1.bf16.msra.mxu1 %v607_v16  ;;  %555 = vmatprep.subr.bf16.mxu0 %v622_v30 }
  0x4b   :  { %273 = vmatprep.subr.bf16.mxu1 %v608_v17 }
  0x4d   :  { %556 = vmatpush3.bf16.msra.mxu0 %v623_v31 }
  0x4e   :  { %274 = vmatpush1.bf16.msra.mxu1 %v610_v18  ;;  %557 = vmatprep.subr.bf16.mxu0 %v624_v32 }
  0x4f   :  { %275 = vmatprep.subr.bf16.mxu1 %v611_v19 }
  0x51   :  { %558 = vmatpush3.bf16.msra.mxu0 %v625_v33 }
  0x52   :  { %276 = vmatpush1.bf16.msra.mxu1 %v613_v20  ;;  %559 = vmatprep.subr.bf16.mxu0 %v626_v42 }
  0x55   :  { %560 = vmatpush3.bf16.msra.mxu0 %v627_v43 }
  0x56   :  { %561 = vmatprep.subr.bf16.mxu0 %v628_v44 }
  0x59   :  { %562 = vmatpush3.bf16.msra.mxu0 %v629_v45 }
  0xfc   :  { %v145_v35 = vpop.f32.mrf.mxu0 }
  0xfd   :  { %v146_v36 = vadd.f32 %v507_v34, %v145_v35 }
  0xfe   :  { %v575_v37 = vpop.f32.mrf.mxu0 }
  0xff   :  { %v151_v38 = vmax.f32 %v146_v36, 0.0 }
 0x100   :  { %v148_v39 = vpop.f32.mrf.mxu0 }
 0x101   :  { %v152_v40 = vpack.c.bf16 %v151_v38, %v151_v38 }
 0x102   :  { %v576_v41 = vpop.f32.mrf.mxu0 }
 0x103   :  { %294 = vmatmul.mubr.bf16.vlgmr.msra.gmra.mxu1 %v152_v40 }
 0x1c3   :  { %v295_v53 = vpop.f32.mrf.mxu1 }
 0x1c4   :  { %v296_v54 = vadd.f32 %v295_v53, %v174_v51 }
 0x1c5   :  { %v297_v55 = vpop.f32.mrf.mxu1 }
 0x1c6   :  { %v298_v56 = vadd.f32 %v297_v55, %v178_v52  ;;  %v302_v57 = vmax.f32 %v296_v54, 0.0 }
 0x1c7   :  { %v299_v58 = vpop.f32.mrf.mxu1 }
 0x1c8   :  { %v303_v59 = vmax.f32 %v298_v56, 0.0  ;;  %v304_v62 = vpack.c.bf16 %v302_v57, %v302_v57 }
 0x1c9   :  { %v300_v60 = vpop.f32.mrf.mxu1 }
 0x1ca   :  { %v305_v61 = vpack.c.bf16 %v303_v59, %v303_v59 }
 0x1cc   :  { %473 = vmatprep.mubr.bf16.mxu0 %v305_v61 }
 0x1cd   :  { %474 = vmatmul.mubr.bf16.vlgmr.msra.gmra.mxu0 %v304_v62 }
 0x28d   :  { %v563_v63 = vpop.f32.mrf.mxu0 }
 0x28f   :  { %v564_v1 = vpop.f32.mrf.mxu0 }
 0x290   :  { %v565_v2 = vadd.f32 %v564_v1, %v563_v63 }
 0x291   :  { %v566_v3 = vpop.f32.mrf.mxu0 }
 0x292   :  { %v476_v4 = vadd.f32 %v565_v2, %v527_v0 }
 0x293   :  { %v567_v5 = vpop.f32.mrf.mxu0 }
 0x294   :  { %481 = vmax.xlane.f32.xlu0 %v476_v4 }
 0x31d   :  { %v482_v6 = vpop.xlane.xlu0 %481 }
 0x31e   :  { %v483_v7 = vsub.f32 %v476_v4, %v482_v6 }
 0x320   :  { %v484_v8 = vmul.f32 1.442695, %v483_v7 }
 0x322   :  { %630 = vpow2.f32 %v484_v8 }
 0x32f   :  { %v631_v9 = vpop.eup %630 }
 0x330   :  { %486 = vadd.xlane.f32.xlu0 %v631_v9 }
 0x3b9   :  { %v487_v10 = vpop.xlane.xlu0 %486 }
 0x3ba   :  { %632 = vlog2.f32 %v487_v10 }
 0x3c7   :  { %v633_v11 = vpop.eup %632 }
 0x3c8   :  { %v489_v12 = vmul.f32 0.6931472, %v633_v11 }
 0x3ca   :  { %v490_v13 = vadd.f32 %v489_v12, %v482_v6 }
 0x3cc   :  { %v491_v14 = vsub.f32 %v476_v4, %v490_v13  ;;  %495 = vst.msk [vmem:[%s817_s8] sm:$0xff] %vm494_vm2, %v490_v13 }
 0x3ce   :  { %493 = vst.msk [vmem:[%s816_s7] sm:$0xff] %vm492_vm3, %v491_v14 }
 0x3cf   :  { %504 = vsyncpa [#allocation3], 1 }
 0x3d0   :  { %505 = vsyncpa [#allocation5], 1 }
 0x3d1   :  { %506 = vsyncpa [#allocation8], 1 }

</bundles_post_ra>
